<compile_context>
chip_gen: v7x
topology: tpu7x:2x2x1
jax: 0.10.0
libtpu: 0.0.40
codegen_flags: <defaults>
</compile_context>

<pallas_src>
import functools

import jax
import jax.numpy as jnp
from jax.experimental import pallas as pl
from jax.experimental.pallas import tpu as pltpu


def _dwconv_block_kernel(x_ref, gamma_ref, beta_ref, wd_ref, wpt_ref, o_ref,
                         *, kernel_size: int, eps: float, conv_dtype):
    # x_ref:     (bt, L, D)  bt sequences of length L (channel-last)
    # gamma_ref: (1, D), beta_ref: (1, D)   LayerNorm affine (f32)
    # wd_ref:    (K, D)   depthwise weights, wd[k, d] = depth.weight[d, 0, k]
    # wpt_ref:   (D, D)   pointwise weights transposed (D_in, D_out), bf16
    bt, L, D = x_ref.shape
    BL = bt * L
    pad = (kernel_size - 1) // 2

    # --- LayerNorm over channels (two-pass variance, matches PyTorch) -------
    # L % 8 == 0 makes the (bt, L, D) -> (BL, D) reshape layout-free.
    x = x_ref[...].astype(jnp.float32).reshape(BL, D)
    inv_d = 1.0 / D
    mu = jnp.sum(x, axis=-1, keepdims=True) * inv_d
    xm = x - mu
    var = jnp.sum(xm * xm, axis=-1, keepdims=True) * inv_d
    y = (xm * jax.lax.rsqrt(var + eps)) * gamma_ref[...] + beta_ref[...]
    y = y.astype(conv_dtype)
    # x / xm are dead here; the residual re-reads x_ref at the very end.

    # --- depthwise conv1d along L ('same' padding, no bias) -----------------
    # Taps are XLU sublane rolls of the flattened (BL, D) slab. Two masks
    # ("row is not the first / not the last row of its sequence") are built
    # once and reused by every tap: re-masking the running roll chain before
    # the next roll zeroes exactly the rows whose source index falls outside
    # [0, L) of its own sequence (no per-tap iota / double compare / pos buf).
    wd = wd_ref[...]                                            # (K, D)
    lpos = jax.lax.broadcasted_iota(jnp.int32, (bt, L, D), 1).reshape(BL, D)
    not_first = lpos != 0
    not_last = lpos != (L - 1)

    z = y * wd[pad, :]                                          # center tap
    a = y                                                       # reads y[l - j]
    b = y                                                       # reads y[l + j]
    for j in range(1, pad + 1):                                 # static, K=2*pad+1
        a = jnp.where(not_first, pltpu.roll(a, shift=1, axis=0), 0)
        b = jnp.where(not_last, pltpu.roll(b, shift=BL - 1, axis=0), 0)
        z = z + a * wd[pad - j, :] + b * wd[pad + j, :]
    z = jnp.maximum(z, 0.0)                                     # ReLU

    # --- pointwise 1x1 conv == one fused (BL, D)@(D, D) bf16 MXU matmul -----
    p = jnp.dot(z.astype(jnp.bfloat16), wpt_ref[...],
                preferred_element_type=jnp.float32)
    p = jnp.maximum(p, 0.0)                                     # ReLU
    # dropout is Identity (dropout=0.0) -> nothing to do

    # --- residual add with the ORIGINAL (pre-LayerNorm) input ---------------
    o_ref[...] = (p.reshape(bt, L, D) + x_ref[...]).astype(o_ref.dtype)


def _pick_batch_tile(B, L, *, max_rows=2048, min_steps=8):
    """Largest divisor of B giving >= min(min_steps, B) pipelined grid steps
    (DMA/compute overlap; >= min_steps/2 steps per TensorCore on v7x) while
    keeping batch_tile*L rows per step under max_rows (VMEM working set)."""
    want_steps = min(min_steps, B)
    bt = max(1, min(B // want_steps, max(1, max_rows // L)))
    while B % bt:
        bt -= 1
    return bt


def depthwise_conv1d_block(x, gamma, beta, w_depth, w_point, *,
                           eps=1e-5, batch_tile=None, conv_dtype=jnp.float32):
    """x: (B, L, D) float32. Returns (B, L, D).

    batch_tile=None auto-picks a divisor of B giving a pipelined multi-step
    grid (best on all generations; shards across both v7x TensorCores with
    several steps per core). conv_dtype=jnp.bfloat16 is available for
    v6e/v7x elementwise speedups (keep f32 on v5e).
    """
    B, L, D = x.shape
    K = w_depth.shape[0]
    assert K % 2 == 1, "odd kernel_size expected for 'same' padding"
    if batch_tile is None:
        batch_tile = _pick_batch_tile(B, L)
    assert B % batch_tile == 0
    grid = (B // batch_tile,)

    gamma = jnp.asarray(gamma, jnp.float32).reshape(1, D)
    beta = jnp.asarray(beta, jnp.float32).reshape(1, D)
    w_depth = jnp.asarray(w_depth, conv_dtype)          # (K, D)
    w_point = jnp.asarray(w_point, jnp.bfloat16)        # (D_in, D_out) MXU operand

    kernel = functools.partial(_dwconv_block_kernel, kernel_size=K, eps=eps,
                               conv_dtype=conv_dtype)

    # Explicit VMEM budget: 2x double-buffered in + 2x out (f32) tiles plus
    # ~8 live tile-sized intermediates plus (double-buffered) weights.
    conv_bytes = jnp.dtype(conv_dtype).itemsize
    tile_rows = batch_tile * L
    est = (4 * tile_rows * D * 4
           + 8 * tile_rows * D * conv_bytes
           + 2 * (D * D * 2 + K * D * conv_bytes + 2 * D * 4))
    vmem_limit = int(min(64 * 2**20, max(32 * 2**20, 2 * est)))

    cost = pl.CostEstimate(
        flops=2 * B * L * D * D + (3 * K + 14) * B * L * D,
        transcendentals=B * L,                           # rsqrt per row
        bytes_accessed=2 * B * L * D * 4 + D * D * 2 + (K + 2) * D * 4,
    )

    return pl.pallas_call(
        kernel,
        out_shape=jax.ShapeDtypeStruct((B, L, D), x.dtype),
        grid_spec=pltpu.PrefetchScalarGridSpec(
            num_scalar_prefetch=0,
            grid=grid,
            in_specs=[
                pl.BlockSpec((batch_tile, L, D), lambda b: (b, 0, 0)),  # x
                pl.BlockSpec((1, D), lambda b: (0, 0)),                 # gamma
                pl.BlockSpec((1, D), lambda b: (0, 0)),                 # beta
                pl.BlockSpec((K, D), lambda b: (0, 0)),                 # depthwise w
                pl.BlockSpec((D, D), lambda b: (0, 0)),                 # pointwise w^T
            ],
            out_specs=pl.BlockSpec((batch_tile, L, D), lambda b: (b, 0, 0)),
        ),
        compiler_params=pltpu.CompilerParams(
            dimension_semantics=("parallel",),
            vmem_limit_bytes=vmem_limit,
        ),
        cost_estimate=cost,
    )(x, gamma, beta, w_depth, w_point)


def _reference(x, gamma, beta, w_depth, w_point, eps=1e-5):
    """Pure-JAX f32 reference mirroring the PyTorch forward."""
    mu = jnp.mean(x, axis=-1, keepdims=True)
    var = jnp.mean((x - mu) ** 2, axis=-1, keepdims=True)
    y = (x - mu) * jax.lax.rsqrt(var + eps) * gamma + beta       # (B, L, D)
    K = w_depth.shape[0]
    pad = (K - 1) // 2
    ypad = jnp.pad(y, ((0, 0), (pad, pad), (0, 0)))
    L = x.shape[1]
    z = sum(ypad[:, k:k + L, :] * w_depth[k][None, None, :] for k in range(K))
    z = jnp.maximum(z, 0.0)
    p = jnp.einsum("bld,de->ble", z, w_point)
    p = jnp.maximum(p, 0.0)
    return p + x


if __name__ == "__main__":
    B, L, D, K = 2, 16, 128, 7   # dim=128, kernel_size=7 as in the module

    key = jax.random.PRNGKey(0)
    kx, kd, kp, kg, kb = jax.random.split(key, 5)

    x = jax.random.normal(kx, (B, L, D), dtype=jnp.float32)

    # Deterministic synthetic parameters (shapes match the PyTorch module):
    #   depth.weight:     (D, 1, K)  -> stored here as (K, D)
    #   pointwise.weight: (D, D, 1)  -> stored here transposed as (D_in, D_out)
    #   layernorm weight/bias: (D,)
    w_depth = jax.random.normal(kd, (K, D), dtype=jnp.float32) * 0.2
    w_point = jax.random.normal(kp, (D, D), dtype=jnp.float32) * 0.05
    gamma = 1.0 + 0.1 * jax.random.normal(kg, (D,), dtype=jnp.float32)
    beta = 0.1 * jax.random.normal(kb, (D,), dtype=jnp.float32)

    ref = _reference(x, gamma, beta, w_depth, w_point)

    # Default path: auto-picked pipelined grid (2 steps at this toy batch).
    out = jax.block_until_ready(
        depthwise_conv1d_block(x, gamma, beta, w_depth, w_point))
    assert out.shape == (B, L, D)
    # bf16 MXU matmul inside the kernel -> looser tolerance than pure f32.
    assert jnp.allclose(out, ref, atol=3e-2, rtol=3e-2), "mismatch vs reference"

    # Explicit single-tile path also exercised (batch_tile override).
    out2 = jax.block_until_ready(
        depthwise_conv1d_block(x, gamma, beta, w_depth, w_point, batch_tile=B))
    assert jnp.allclose(out2, ref, atol=3e-2, rtol=3e-2), "mismatch (monolithic)"

    print("KERNEL_OK")
</pallas_src>

<mosaic_0001>
module attributes {stable_mosaic.version = 11 : i64} {
  func.func @_dwconv_block_kernel(%arg0: i32, %arg1: memref<1x16x128xf32, #tpu.memory_space<vmem>>, %arg2: memref<1x128xf32, #tpu.memory_space<vmem>>, %arg3: memref<1x128xf32, #tpu.memory_space<vmem>>, %arg4: memref<7x128xf32, #tpu.memory_space<vmem>>, %arg5: memref<128x128xbf16, #tpu.memory_space<vmem>>, %arg6: memref<1x16x128xf32, #tpu.memory_space<vmem>>) attributes {dimension_semantics = [#tpu.dimension_semantics<parallel>], iteration_bounds = array<i64: 2>, scalar_prefetch = 0 : i64, scratch_operands = 0 : i64, tpu.core_type = #tpu.core_type<tc>, window_params = [{transform_indices = @transform_0, window_bounds = array<i64: 1, 16, 128>}, {pipeline_mode = #tpu.pipeline_mode<synchronous>, transform_indices = @transform_1, window_bounds = array<i64: 1, 128>}, {pipeline_mode = #tpu.pipeline_mode<synchronous>, transform_indices = @transform_2, window_bounds = array<i64: 1, 128>}, {pipeline_mode = #tpu.pipeline_mode<synchronous>, transform_indices = @transform_3, window_bounds = array<i64: 7, 128>}, {pipeline_mode = #tpu.pipeline_mode<synchronous>, transform_indices = @transform_4, window_bounds = array<i64: 128, 128>}, {transform_indices = @transform_5, window_bounds = array<i64: 1, 16, 128>}]} {
    %c0 = arith.constant 0 : index
    %c0_0 = arith.constant 0 : index
    %c0_1 = arith.constant 0 : index
    %0 = vector.load %arg1[%c0, %c0_0, %c0_1] : memref<1x16x128xf32, #tpu.memory_space<vmem>>, vector<1x16x128xf32>
    %1 = vector.shape_cast %0 : vector<1x16x128xf32> to vector<16x128xf32>
    %cst = arith.constant dense<0.000000e+00> : vector<16xf32>
    %2 = vector.multi_reduction <add>, %1, %cst [1] : vector<16x128xf32> to vector<16xf32>
    %3 = vector.shape_cast %2 : vector<16xf32> to vector<16x1xf32>
    %cst_2 = arith.constant 7.812500e-03 : f32
    %4 = vector.broadcast %cst_2 : f32 to vector<16x1xf32>
    %5 = arith.mulf %3, %4 : vector<16x1xf32>
    %6 = vector.broadcast %5 : vector<16x1xf32> to vector<16x128xf32>
    %7 = arith.subf %1, %6 : vector<16x128xf32>
    %8 = arith.mulf %7, %7 : vector<16x128xf32>
    %cst_3 = arith.constant dense<0.000000e+00> : vector<16xf32>
    %9 = vector.multi_reduction <add>, %8, %cst_3 [1] : vector<16x128xf32> to vector<16xf32>
    %10 = vector.shape_cast %9 : vector<16xf32> to vector<16x1xf32>
    %cst_4 = arith.constant 7.812500e-03 : f32
    %11 = vector.broadcast %cst_4 : f32 to vector<16x1xf32>
    %12 = arith.mulf %10, %11 : vector<16x1xf32>
    %cst_5 = arith.constant 9.99999974E-6 : f32
    %13 = vector.broadcast %cst_5 : f32 to vector<16x1xf32>
    %14 = arith.addf %12, %13 : vector<16x1xf32>
    %15 = math.rsqrt %14 : vector<16x1xf32>
    %16 = vector.broadcast %15 : vector<16x1xf32> to vector<16x128xf32>
    %17 = arith.mulf %7, %16 : vector<16x128xf32>
    %c0_6 = arith.constant 0 : index
    %c0_7 = arith.constant 0 : index
    %18 = vector.load %arg2[%c0_6, %c0_7] : memref<1x128xf32, #tpu.memory_space<vmem>>, vector<1x128xf32>
    %19 = vector.broadcast %18 : vector<1x128xf32> to vector<16x128xf32>
    %20 = arith.mulf %17, %19 : vector<16x128xf32>
    %c0_8 = arith.constant 0 : index
    %c0_9 = arith.constant 0 : index
    %21 = vector.load %arg3[%c0_8, %c0_9] : memref<1x128xf32, #tpu.memory_space<vmem>>, vector<1x128xf32>
    %22 = vector.broadcast %21 : vector<1x128xf32> to vector<16x128xf32>
    %23 = arith.addf %20, %22 : vector<16x128xf32>
    %c0_10 = arith.constant 0 : index
    %c0_11 = arith.constant 0 : index
    %24 = vector.load %arg4[%c0_10, %c0_11] : memref<7x128xf32, #tpu.memory_space<vmem>>, vector<7x128xf32>
    %25 = tpu.iota {dimensions = array<i32: 1>} : vector<1x16x128xi32>
    %26 = vector.shape_cast %25 : vector<1x16x128xi32> to vector<16x128xi32>
    %c0_i32 = arith.constant 0 : i32
    %27 = vector.broadcast %c0_i32 : i32 to vector<16x128xi32>
    %28 = arith.cmpi ne, %26, %27 : vector<16x128xi32>
    %c15_i32 = arith.constant 15 : i32
    %29 = vector.broadcast %c15_i32 : i32 to vector<16x128xi32>
    %30 = arith.cmpi ne, %26, %29 : vector<16x128xi32>
    %31 = vector.extract_strided_slice %24 {offsets = [3, 0], sizes = [1, 128], strides = [1, 1]} : vector<7x128xf32> to vector<1x128xf32>
    %32 = vector.shape_cast %31 : vector<1x128xf32> to vector<128xf32>
    %33 = vector.shape_cast %32 : vector<128xf32> to vector<1x128xf32>
    %34 = vector.broadcast %33 : vector<1x128xf32> to vector<16x128xf32>
    %35 = arith.mulf %23, %34 : vector<16x128xf32>
    %c1_i32 = arith.constant 1 : i32
    %36 = tpu.dynamic_rotate %23 by %c1_i32 dim 0 : vector<16x128xf32>, i32 -> vector<16x128xf32>
    %c0_i32_12 = arith.constant 0 : i32
    %37 = arith.sitofp %c0_i32_12 : i32 to f32
    %38 = vector.broadcast %37 : f32 to vector<16x128xf32>
    %39 = arith.select %28, %36, %38 : vector<16x128xi1>, vector<16x128xf32>
    %c15_i32_13 = arith.constant 15 : i32
    %40 = tpu.dynamic_rotate %23 by %c15_i32_13 dim 0 : vector<16x128xf32>, i32 -> vector<16x128xf32>
    %c0_i32_14 = arith.constant 0 : i32
    %41 = arith.sitofp %c0_i32_14 : i32 to f32
    %42 = vector.broadcast %41 : f32 to vector<16x128xf32>
    %43 = arith.select %30, %40, %42 : vector<16x128xi1>, vector<16x128xf32>
    %44 = vector.extract_strided_slice %24 {offsets = [2, 0], sizes = [1, 128], strides = [1, 1]} : vector<7x128xf32> to vector<1x128xf32>
    %45 = vector.shape_cast %44 : vector<1x128xf32> to vector<128xf32>
    %46 = vector.shape_cast %45 : vector<128xf32> to vector<1x128xf32>
    %47 = vector.broadcast %46 : vector<1x128xf32> to vector<16x128xf32>
    %48 = arith.mulf %39, %47 : vector<16x128xf32>
    %49 = arith.addf %35, %48 : vector<16x128xf32>
    %50 = vector.extract_strided_slice %24 {offsets = [4, 0], sizes = [1, 128], strides = [1, 1]} : vector<7x128xf32> to vector<1x128xf32>
    %51 = vector.shape_cast %50 : vector<1x128xf32> to vector<128xf32>
    %52 = vector.shape_cast %51 : vector<128xf32> to vector<1x128xf32>
    %53 = vector.broadcast %52 : vector<1x128xf32> to vector<16x128xf32>
    %54 = arith.mulf %43, %53 : vector<16x128xf32>
    %55 = arith.addf %49, %54 : vector<16x128xf32>
    %c1_i32_15 = arith.constant 1 : i32
    %56 = tpu.dynamic_rotate %39 by %c1_i32_15 dim 0 : vector<16x128xf32>, i32 -> vector<16x128xf32>
    %c0_i32_16 = arith.constant 0 : i32
    %57 = arith.sitofp %c0_i32_16 : i32 to f32
    %58 = vector.broadcast %57 : f32 to vector<16x128xf32>
    %59 = arith.select %28, %56, %58 : vector<16x128xi1>, vector<16x128xf32>
    %c15_i32_17 = arith.constant 15 : i32
    %60 = tpu.dynamic_rotate %43 by %c15_i32_17 dim 0 : vector<16x128xf32>, i32 -> vector<16x128xf32>
    %c0_i32_18 = arith.constant 0 : i32
    %61 = arith.sitofp %c0_i32_18 : i32 to f32
    %62 = vector.broadcast %61 : f32 to vector<16x128xf32>
    %63 = arith.select %30, %60, %62 : vector<16x128xi1>, vector<16x128xf32>
    %64 = vector.extract_strided_slice %24 {offsets = [1, 0], sizes = [1, 128], strides = [1, 1]} : vector<7x128xf32> to vector<1x128xf32>
    %65 = vector.shape_cast %64 : vector<1x128xf32> to vector<128xf32>
    %66 = vector.shape_cast %65 : vector<128xf32> to vector<1x128xf32>
    %67 = vector.broadcast %66 : vector<1x128xf32> to vector<16x128xf32>
    %68 = arith.mulf %59, %67 : vector<16x128xf32>
    %69 = arith.addf %55, %68 : vector<16x128xf32>
    %70 = vector.extract_strided_slice %24 {offsets = [5, 0], sizes = [1, 128], strides = [1, 1]} : vector<7x128xf32> to vector<1x128xf32>
    %71 = vector.shape_cast %70 : vector<1x128xf32> to vector<128xf32>
    %72 = vector.shape_cast %71 : vector<128xf32> to vector<1x128xf32>
    %73 = vector.broadcast %72 : vector<1x128xf32> to vector<16x128xf32>
    %74 = arith.mulf %63, %73 : vector<16x128xf32>
    %75 = arith.addf %69, %74 : vector<16x128xf32>
    %c1_i32_19 = arith.constant 1 : i32
    %76 = tpu.dynamic_rotate %59 by %c1_i32_19 dim 0 : vector<16x128xf32>, i32 -> vector<16x128xf32>
    %c0_i32_20 = arith.constant 0 : i32
    %77 = arith.sitofp %c0_i32_20 : i32 to f32
    %78 = vector.broadcast %77 : f32 to vector<16x128xf32>
    %79 = arith.select %28, %76, %78 : vector<16x128xi1>, vector<16x128xf32>
    %c15_i32_21 = arith.constant 15 : i32
    %80 = tpu.dynamic_rotate %63 by %c15_i32_21 dim 0 : vector<16x128xf32>, i32 -> vector<16x128xf32>
    %c0_i32_22 = arith.constant 0 : i32
    %81 = arith.sitofp %c0_i32_22 : i32 to f32
    %82 = vector.broadcast %81 : f32 to vector<16x128xf32>
    %83 = arith.select %30, %80, %82 : vector<16x128xi1>, vector<16x128xf32>
    %84 = vector.extract_strided_slice %24 {offsets = [0, 0], sizes = [1, 128], strides = [1, 1]} : vector<7x128xf32> to vector<1x128xf32>
    %85 = vector.shape_cast %84 : vector<1x128xf32> to vector<128xf32>
    %86 = vector.shape_cast %85 : vector<128xf32> to vector<1x128xf32>
    %87 = vector.broadcast %86 : vector<1x128xf32> to vector<16x128xf32>
    %88 = arith.mulf %79, %87 : vector<16x128xf32>
    %89 = arith.addf %75, %88 : vector<16x128xf32>
    %90 = vector.extract_strided_slice %24 {offsets = [6, 0], sizes = [1, 128], strides = [1, 1]} : vector<7x128xf32> to vector<1x128xf32>
    %91 = vector.shape_cast %90 : vector<1x128xf32> to vector<128xf32>
    %92 = vector.shape_cast %91 : vector<128xf32> to vector<1x128xf32>
    %93 = vector.broadcast %92 : vector<1x128xf32> to vector<16x128xf32>
    %94 = arith.mulf %83, %93 : vector<16x128xf32>
    %95 = arith.addf %89, %94 : vector<16x128xf32>
    %cst_23 = arith.constant 0.000000e+00 : f32
    %96 = vector.broadcast %cst_23 : f32 to vector<16x128xf32>
    %97 = arith.maximumf %95, %96 : vector<16x128xf32>
    %98 = arith.truncf %97 : vector<16x128xf32> to vector<16x128xbf16>
    %c0_24 = arith.constant 0 : index
    %c0_25 = arith.constant 0 : index
    %99 = vector.load %arg5[%c0_24, %c0_25] : memref<128x128xbf16, #tpu.memory_space<vmem>>, vector<128x128xbf16>
    %cst_26 = arith.constant dense<0.000000e+00> : vector<16x128xf32>
    %100 = tpu.matmul %98, %99, %cst_26 {dimension_numbers = #tpu.dot_dimension_numbers<[1], [0], [0], [1], [0, 0, 1, 1], [], []>} : vector<16x128xbf16>, vector<128x128xbf16>, vector<16x128xf32> -> vector<16x128xf32>
    %cst_27 = arith.constant 0.000000e+00 : f32
    %101 = vector.broadcast %cst_27 : f32 to vector<16x128xf32>
    %102 = arith.maximumf %100, %101 : vector<16x128xf32>
    %103 = vector.shape_cast %102 : vector<16x128xf32> to vector<1x16x128xf32>
    %c0_28 = arith.constant 0 : index
    %c0_29 = arith.constant 0 : index
    %c0_30 = arith.constant 0 : index
    %104 = vector.load %arg1[%c0_28, %c0_29, %c0_30] : memref<1x16x128xf32, #tpu.memory_space<vmem>>, vector<1x16x128xf32>
    %105 = arith.addf %103, %104 : vector<1x16x128xf32>
    %c0_31 = arith.constant 0 : index
    %c0_32 = arith.constant 0 : index
    %c0_33 = arith.constant 0 : index
    %106 = vector.load %arg6[%c0_31, %c0_32, %c0_33] : memref<1x16x128xf32, #tpu.memory_space<vmem>>, vector<1x16x128xf32>
    tpu.vector_store %arg6[%c0_31, %c0_32, %c0_33], %105 {strides = array<i32>} : memref<1x16x128xf32, #tpu.memory_space<vmem>>, vector<1x16x128xf32>,
    return
  }
  func.func @transform_0(%arg0: i32) -> (i32, i32, i32) {
    %c0_i32 = arith.constant 0 : i32
    %c0_i32_0 = arith.constant 0 : i32
    %c0_i32_1 = arith.constant 0 : i32
    return %arg0, %c0_i32, %c0_i32_0 : i32, i32, i32
  }
  func.func @transform_1(%arg0: i32) -> (i32, i32) {
    %c0_i32 = arith.constant 0 : i32
    %c0_i32_0 = arith.constant 0 : i32
    %c0_i32_1 = arith.constant 0 : i32
    return %c0_i32, %c0_i32_0 : i32, i32
  }
  func.func @transform_2(%arg0: i32) -> (i32, i32) {
    %c0_i32 = arith.constant 0 : i32
    %c0_i32_0 = arith.constant 0 : i32
    %c0_i32_1 = arith.constant 0 : i32
    return %c0_i32, %c0_i32_0 : i32, i32
  }
  func.func @transform_3(%arg0: i32) -> (i32, i32) {
    %c0_i32 = arith.constant 0 : i32
    %c0_i32_0 = arith.constant 0 : i32
    %c0_i32_1 = arith.constant 0 : i32
    return %c0_i32, %c0_i32_0 : i32, i32
  }
  func.func @transform_4(%arg0: i32) -> (i32, i32) {
    %c0_i32 = arith.constant 0 : i32
    %c0_i32_0 = arith.constant 0 : i32
    %c0_i32_1 = arith.constant 0 : i32
    return %c0_i32, %c0_i32_0 : i32, i32
  }
  func.func @transform_5(%arg0: i32) -> (i32, i32, i32) {
    %c0_i32 = arith.constant 0 : i32
    %c0_i32_0 = arith.constant 0 : i32
    %c0_i32_1 = arith.constant 0 : i32
    return %arg0, %c0_i32, %c0_i32_0 : i32, i32, i32
  }
}

</mosaic_0001>

<bundles_post_ra>
// kernel: tpu_custom_call.1
= control target key start
LH: loop header
LB: loop body
LE: loop exit
PB: predicated region body
PF: predicated region fallthrough
CT: control target
= control target key end

     0   :  { %10 = vsyncpa [#allocation3], 0  ;;  %s1202_s0 = inlined_call_operand.hbm [shape: f32[2,16,128], index: 0, kind: input, shape index: {}]   ;;  %s1203_s1 = inlined_call_operand.vmem [shape: f32[1,128], index: 1, kind: input, shape index: {}]   ;;  %s1204_s2 = inlined_call_operand.vmem [shape: f32[1,128], index: 2, kind: input, shape index: {}]   ;;  %s1205_s3 = inlined_call_operand.vmem [shape: f32[7,128], index: 3, kind: input, shape index: {}]   ;;  %s1206_s4 = inlined_call_operand.hbm [shape: bf16[128,128], index: 4, kind: input, shape index: {}]   ;;  %s1207_s5 = inlined_call_operand.hbm [shape: f32[2,16,128], index: 5, kind: output, shape index: {}]  }
   0x1   :  { %12 = vsyncpa [#allocation3 + $0x1], 0 }
   0x2   :  { %13 = vsyncpa [#allocation6], 0 }
   0x3   :  { %14 = vsyncpa [#allocation4], 0 }
   0x4   :  { %16 = vsyncpa [#allocation4 + $0x1], 0  ;;  %s917_s18 = smov 0   ;;  %s919_s19 = smov 0  }
   0x5   :  { %s921_s20 = smov 0   ;;  %s923_s21 = smov 0  }
   0x6 LB: > { %s938_s22 = sadd.s32 4294967295, %s874_s21   ;;  %s612_s23 = sadd.s32 4294967294, %s874_s21   ;;  %s874_s21 = sphi %s923_s21, %s1227_s21   ;;  %s870_s20 = sphi %s921_s20, %s1226_s20   ;;  %s866_s19 = sphi %s919_s19, %s1225_s19   ;;  %s862_s18 = sphi %s917_s18, %s1224_s18  }
   0x7   : > { %p42_p0 = scmp.ne.s32.totalorder %s866_s19, %s862_s18  ;;  %p1208_p1 = scmp.eq.s32.totalorder %s938_s22, 0 }
   0x8   : > { %p156_p3 = scmp.eq.s32.totalorder %s612_s23, 1  ;;  %p613_p5 = scmp.ge.s32.totalorder %s874_s21, 1 }
   0x9   : > { %p947_p4 = por %p1208_p1, %p42_p0  ;;  %p163_p7 = scmp.lt.s32.totalorder %s874_s21, 3 }
   0xa   : > { %p952_p6 = por %p156_p3, %p42_p0  ;;  %s876_s27 = smov [#allocation5]  }
   0xb   : > { %s1211_s24 = scalar_select %p947_p4, 1, 0 }
   0xc   : > { %s1212_s25 = scalar_select %p952_p6, 1, 0 }
   0xd   : > { %p957_p8 = pnand %p613_p5, %p163_p7  ;;  %s184_s28 = sshll.u32 %s876_s27, 4  ;;  %s961_s28 = int_to_ptr.vmem [resolvable:$true] %s184_s28 }
   0xe   : > { %s973_s30 = sadd.s32 1, %s874_s21   ;;  %s29_s6 = sadd.s32 1, %s870_s20 }
   0xf   : > { %s1213_s26 = scalar_select %p957_p8, 1, 0 }
  0x10   : > { %p677_p9 = pneg %p957_p8  ;;  %s26_s7 = ssub.s32 %s874_s21, %s973_s30 }
  0x11   : > { %s746_s10 = scalar_lea.hbm %s1206_s4, 1024 }
  0x12   : > { %p968_p11 = pnand %p677_p9, %p1208_p1  ;;  %p747_p12 = scmp.ne.s32.totalorder %s1206_s4, %s746_s10 }
  0x13   : > { %p753_p5 = scmp.lt.u32.totalorder %s746_s10, %s1206_s4 }
  0x14   : > { %p748_p13 = pneg %p968_p11 }
  0x16   : > { %p749_p0 = pnand %p748_p13, %p747_p12 }
  0x18   : > { %p750_p3 = pneg %p749_p0 }
  0x1a   : > { %p755_p7 = pnand %p753_p5, %p750_p3 }
  0x1c   : > { %758 = shalt.err (!%p755_p7)
}
  0x1d   : > { %s759_s15 = scalar_lea.vmem %s961_s28, 1024  ;;  %p767_p2 = scmp.lt.s32.totalorder %s961_s28, %s961_s28 }
  0x1e   : > { %p760_p9 = scmp.ne.s32.totalorder %s961_s28, %s759_s15  ;;  %p768_p6 = scmp.lt.s32.totalorder %s759_s15, %s759_s15 }
  0x20   : > { %p762_p10 = pnand %p760_p9, %p748_p13  ;;  %p769_p4 = por %p768_p6, %p767_p2 }
  0x22   : > { %p763_p1 = pneg %p762_p10 }
  0x24   : > { %p770_p8 = pnand %p769_p4, %p763_p1 }
  0x26   : > { %773 = shalt.err (!%p770_p8)
}
  0x27   : > { %s877_s16 = smov 64   ;;  %s878_s17 = smov 4  }
  0x28   : > { %680 = dma.hbm_to_vmem [thread:$0]  (!%p968_p11), %s1206_s4, 1024, %s961_s28, [#allocation6], %s877_s16, %s877_s16, %s878_s17  }
  0x29   : > { %p27_p2 = scmp.eq.s32.totalorder %s26_s7, 0  ;;  %p36_p1 = scmp.ne.s32.totalorder %s870_s20, %s866_s19 }
  0x2a   : > { %p37_p4 = scmp.eq.s32.totalorder %s874_s21, 0  ;;  %p690_p6 = scmp.lt.s32.totalorder %s874_s21, 2 }
  0x2b   : > { %s1004_s8 = scalar_select %p27_p2, %s870_s20, %s29_s6  }
  0x2c   : > { %p38_p8 = por %p37_p4, %p36_p1  ;;  %p1215_p10 = scmp.eq.s32.totalorder %s938_s22, 1 }
  0x2d   : > { %s198_s10 = sand.u32 1, %s870_s20   ;;  %s638_s11 = sshll.u32 %s874_s21, 8 }
  0x2e   : > { %p1008_p12 = por %p1215_p10, %p36_p1  ;;  %s616_s12 = sshll.u32 %s198_s10, 4 }
  0x2f   : > { %s1017_s14 = scalar_lea.hbm %s1202_s0, %s638_s11  ;;  %s202_s28 = scalar_lea.vmem [#allocation2], %s616_s12 }
  0x30   : > { %s209_s6 = sshll.u32 %s202_s28, 4  ;;  %p1019_p11 = pnand %p690_p6, %p38_p8  ;;  %s1023_s6 = int_to_ptr.vmem [resolvable:$true] %s209_s6 }
  0x31   : > { %s1025_s15 = scalar_lea.sflag [#allocation3], %s198_s10  ;;  %s774_s16 = scalar_lea.hbm %s1017_s14, 256 }
  0x32   : > { %p775_p13 = scmp.ne.s32.totalorder %s1017_s14, %s774_s16  ;;  %p776_p0 = pneg %p1019_p11 }
  0x33   : > { %s779_s27 = scalar_lea.hbm %s1202_s0, 512  ;;  %p780_p7 = scmp.lt.u32.totalorder %s1017_s14, %s1202_s0 }
  0x34   : > { %p777_p3 = pnand %p776_p0, %p775_p13  ;;  %p781_p9 = scmp.lt.u32.totalorder %s779_s27, %s774_s16 }
  0x35   : > { %p783_p1 = scmp.lt.u32.totalorder %s774_s16, %s1017_s14 }
  0x36   : > { %p778_p5 = pneg %p777_p3  ;;  %p782_p2 = por %p781_p9, %p780_p7 }
  0x38   : > { %p784_p4 = por %p783_p1, %p782_p2 }
  0x3a   : > { %p785_p6 = pnand %p784_p4, %p778_p5 }
  0x3c   : > { %788 = shalt.err (!%p785_p6)
}
  0x3d   : > { %s789_s10 = scalar_lea.vmem %s1023_s6, 256  ;;  %s879_s29 = smov [#allocation2]  }
  0x3e   : > { %p790_p8 = scmp.ne.s32.totalorder %s1023_s6, %s789_s10  ;;  %s794_s13 = sshll.u32 %s879_s29, 4  ;;  %s795_s13 = int_to_ptr.vmem [resolvable:$false] %s794_s13 }
  0x3f   : > { %s796_s28 = scalar_lea.vmem %s795_s13, 512  ;;  %p797_p3 = scmp.lt.s32.totalorder %s1023_s6, %s795_s13 }
  0x40   : > { %p792_p10 = pnand %p790_p8, %p776_p0  ;;  %p798_p7 = scmp.lt.s32.totalorder %s796_s28, %s789_s10 }
  0x42   : > { %p793_p13 = pneg %p792_p10  ;;  %p799_p9 = por %p798_p7, %p797_p3 }
  0x44   : > { %p800_p2 = pnand %p799_p9, %p793_p13 }
  0x46   : > { %803 = shalt.err (!%p800_p2)
}
  0x47   : > { %s880_s16 = smov 128   ;;  %s881_s17 = smov 8  }
  0x48   : > { %684 = dma.hbm_to_vmem [thread:$0]  (!%p1019_p11), %s1017_s14, 256, %s1023_s6, %s1025_s15, %s880_s16, %s880_s16, %s881_s17  }
  0x49   : > { %p1218_p0 = scmp.ne.s32.totalorder %s1213_s26, 0 }
  0x4a   : > { %s1056_s23 = sand.u32 (!%p1218_p0), 1, %s866_s19   ;;  %p1219_p5 = scmp.ne.s32.totalorder (!%p1218_p0), %s1211_s24, 0 }
  0x4b   : > { %221 = sbr.rel (%p1218_p0) target bundleno = 658 (0x292), region = 40  ;;  %s620_s27 = sshll.u32 (!%p1218_p0), %s1056_s23, 4 }
  0x4c   : > { %s224_s11 = scalar_lea.sflag (!%p1218_p0), [#allocation3], %s1056_s23  ;;  %s227_s12 = scalar_lea.vmem (!%p1218_p0), [#allocation2], %s620_s27 }
  0x52   : > { %849 = dma.done.wait (%p1219_p5), %s224_s11, 256  }
  0x53   : > { %851 = vsyncadd (%p1219_p5), %s224_s11, 4294967040  ;;  %p1220_p11 = scmp.eq.s32.totalorder %s938_s22, 0 }
  0x55   : > { %853 = dma.done.wait (%p1220_p11), [#allocation6], 1024   ;;  %p1221_p1 = pmov %p1220_p11 }
  0x56   : > { %v1070_v0 = vld [vmem:[%s227_s12] sm:$0xff]  ;;  %v1072_v1 = vld [vmem:[%s227_s12 + $0x8] sm:$0xff]  ;;  %v882_v11 = vmov 0.0   ;;  %vm883_vm0 = vmmov 0   ;;  %v302_v25 = vlaneseq  ;;  %s257_s10 = scalar_lea.vmem [#allocation7], %s620_s27  ;;  %s639_s13 = sshll.u32 %s938_s22, 8 }
  0x57   : > { %855 = vsyncadd (%p1221_p1), [#allocation6], 4294966272  ;;  %261 = vadd.xlane.f32.xlu0 %v1070_v0  ;;  %v734_v10 = vld [vmem:[#allocation5] sm:$0xff]   ;;  %649 = vmatprep.subr.bf16.mxu0 %v882_v11  ;;  %v735_v12 = vld [vmem:[#allocation5 + $0x8] sm:$0xff]   ;;  %s529_s29 = sshll.u32 %s257_s10, 4  ;;  %s1157_s17 = scalar_lea.hbm %s1207_s5, %s639_s13  ;;  %s1152_s29 = int_to_ptr.vmem [resolvable:$true] %s529_s29 }
  0x58   : > { %650 = vmatpush3.bf16.msra.mxu0 %v734_v10  ;;  %v736_v13 = vld [vmem:[#allocation5 + $0x10] sm:$0xff]   ;;  %v737_v14 = vld [vmem:[#allocation5 + $0x18] sm:$0xff]   ;;  %665 = vmatprep.mubr.msk.bf16.mxu0 %vm883_vm0, %v882_v11  ;;  %v738_v15 = vld [vmem:[#allocation5 + $0x20] sm:$0xff]   ;;  %v1081_v28 = vshrl.u32 %v302_v25, 7  ;;  %s516_s22 = scalar_lea.sflag [#allocation4], %s1056_s23  ;;  %s804_s27 = scalar_lea.vmem %s1152_s29, 256 }
  0x59   : > { %651 = vmatprep.subr.bf16.mxu0 %v882_v11  ;;  %v739_v16 = vld [vmem:[#allocation5 + $0x28] sm:$0xff]   ;;  %v740_v17 = vld [vmem:[#allocation5 + $0x30] sm:$0xff]   ;;  %v741_v18 = vld [vmem:[#allocation5 + $0x38] sm:$0xff]   ;;  %p805_p4 = scmp.ne.s32.totalorder %s1152_s29, %s804_s27  ;;  %s884_s11 = smov [#allocation7]  }
  0x5a   : > { %v623_v27 = vld [vmem:[%s1203_s1] ss:$0 sm:$0xff]  ;;  %v311_v33 = vsub.s32 3, %v1081_v28  ;;  %v1093_v36 = vadd.s32 8, %v1081_v28  ;;  %v331_v37 = vsub.s32 2, %v1081_v28  ;;  %v339_v38 = vsub.s32 4, %v1081_v28 }
  0x5b   : > { %263 = vadd.xlane.f32.xlu0 %v1072_v1  ;;  %v624_v32 = vld [vmem:[%s1204_s2] ss:$0 sm:$0xff]  ;;  %v359_v39 = vsub.s32 1, %v1081_v28  ;;  %v367_v43 = vsub.s32 5, %v1081_v28  ;;  %vm305_vm1 = vcmp.ne.s32.totalorder %v1081_v28, 0  ;;  %vm317_vm2 = vcmp.lt.s32.totalorder %v1081_v28, 1  ;;  %p806_p6 = pnand %p805_p4, %p1008_p12 }
  0x5c   : > { %652 = vmatpush3.bf16.msra.mxu0 %v735_v12  ;;  %v1090_v35 = vld [vmem:[%s1205_s3] sm:$0x7f]  ;;  %vm324_vm3 = vcmp.lt.s32.totalorder %v1081_v28, 7  ;;  %vm308_vm4 = vcmp.ne.s32.totalorder %v1093_v36, 15  ;;  %v387_v54 = vsub.s32 0, %v1081_v28  ;;  %v395_v55 = vsub.s32 6, %v1081_v28 }
  0x5d   : > { %653 = vmatprep.subr.bf16.mxu0 %v882_v11  ;;  %v312_v42 = vrot.slane %v1090_v35, %v311_v33  ;;  %v332_v45 = vrot.slane %v1090_v35, %v331_v37  ;;  %v340_v46 = vrot.slane %v1090_v35, %v339_v38  ;;  %v360_v47 = vrot.slane %v1090_v35, %v359_v39  ;;  %p807_p8 = pneg %p806_p6  ;;  %s808_s12 = sshll.u32 %s884_s11, 4  ;;  %s809_s12 = int_to_ptr.vmem [resolvable:$false] %s808_s12 }
  0x5e   : > { %v368_v53 = vrot.slane %v1090_v35, %v367_v43  ;;  %v396_v33 = vrot.slane %v1090_v35, %v395_v55  ;;  %s810_s24 = scalar_lea.vmem %s809_s12, 512  ;;  %p811_p10 = scmp.lt.s32.totalorder %s1152_s29, %s809_s12 }
  0x5f   : > { %p812_p13 = scmp.lt.s32.totalorder %s810_s24, %s804_s27 }
  0x60   : > { %654 = vmatpush3.bf16.msra.mxu0 %v736_v13 }
  0x61   : > { %655 = vmatprep.subr.bf16.mxu0 %v882_v11  ;;  %p813_p3 = por %p812_p13, %p811_p10 }
  0x63   : > { %p814_p7 = pnand %p813_p3, %p807_p8 }
  0x64   : > { %656 = vmatpush3.bf16.msra.mxu0 %v737_v14 }
  0x65   : > { %657 = vmatprep.subr.bf16.mxu0 %v882_v11 }
  0x68   : > { %658 = vmatpush3.bf16.msra.mxu0 %v738_v15 }
  0x69   : > { %659 = vmatprep.subr.bf16.mxu0 %v882_v11 }
  0x6c   : > { %660 = vmatpush3.bf16.msra.mxu0 %v739_v16 }
  0x6d   : > { %661 = vmatprep.subr.bf16.mxu0 %v882_v11 }
  0x70   : > { %662 = vmatpush3.bf16.msra.mxu0 %v740_v17 }
  0x71   : > { %663 = vmatprep.subr.bf16.mxu0 %v882_v11 }
  0x74   : > { %664 = vmatpush3.bf16.msra.mxu0 %v741_v18 }
  0xe4   : > { %v262_v2 = vpop.xlane.xlu0 %261 }
  0xe5   : > { %v265_v3 = vmul.f32 0.0078125, %v262_v2 }
  0xe7   : > { %v267_v4 = vsub.f32 %v1070_v0, %v265_v3 }
  0xe8   : > { %v264_v5 = vpop.xlane.xlu0 %263 }
  0xe9   : > { %v266_v6 = vmul.f32 0.0078125, %v264_v5  ;;  %v269_v7 = vmul.f32 %v267_v4, %v267_v4 }
  0xeb   : > { %v268_v8 = vsub.f32 %v1072_v1, %v266_v6  ;;  %271 = vadd.xlane.f32.xlu1 %v269_v7 }
  0xed   : > { %v270_v9 = vmul.f32 %v268_v8, %v268_v8 }
  0xef   : > { %273 = vadd.xlane.f32.xlu1 %v270_v9  ;;  %v388_v9 = vrot.slane %v1090_v35, %v387_v54 }
 0x178   : > { %v272_v19 = vpop.xlane.xlu1 %271 }
 0x179   : > { %v275_v20 = vmul.f32 0.0078125, %v272_v19 }
 0x17b   : > { %v277_v21 = vadd.f32 1e-05, %v275_v20 }
 0x17c   : > { %v274_v22 = vpop.xlane.xlu1 %273 }
 0x17d   : > { %742 = vrsqrt.f32 %v277_v21  ;;  %v276_v23 = vmul.f32 0.0078125, %v274_v22 }
 0x17f   : > { %v278_v24 = vadd.f32 1e-05, %v276_v23 }
 0x181   : > { %744 = vrsqrt.f32 %v278_v24 }
 0x187   : > { %v743_v26 = vpop.eup %742 }
 0x188   : > { %v281_v29 = vmul.f32 %v743_v26, %v267_v4 }
 0x18a   : > { %v290_v30 = vmul.f32 %v623_v27, %v281_v29 }
 0x18b   : > { %v745_v31 = vpop.eup %744 }
 0x18c   : > { %v282_v34 = vmul.f32 %v745_v31, %v268_v8  ;;  %v299_v40 = vadd.f32 %v624_v32, %v290_v30 }
 0x18e   : > { %v291_v41 = vmul.f32 %v623_v27, %v282_v34  ;;  %v315_v48 = vrot.slane %v299_v40, 7  ;;  %v322_v50 = vrot.slane %v299_v40, 1  ;;  %v313_v52 = vmul.f32 %v312_v42, %v299_v40 }
 0x190   : > { %v300_v44 = vadd.f32 %v624_v32, %v291_v41 }
 0x192   : > { %v316_v49 = vrot.slane %v300_v44, 7  ;;  %v323_v51 = vrot.slane %v300_v44, 1  ;;  %v314_v60 = vmul.f32 %v312_v42, %v300_v44 }
 0x194   : > { %v318_v56 = vsel %vm317_vm2, %v315_v48, %v316_v49  ;;  %v319_v57 = vsel %vm317_vm2, %v316_v49, %v315_v48  ;;  %v325_v58 = vsel %vm324_vm3, %v322_v50, %v323_v51  ;;  %v326_v59 = vsel %vm324_vm3, %v323_v51, %v322_v50 }
 0x195   : > { %v320_v61 = vsel %vm305_vm1, %v319_v57, 0.0  ;;  %v328_v62 = vsel %vm308_vm4, %v326_v59, 0.0  ;;  %v334_v63 = vmul.f32 %v332_v45, %v318_v56  ;;  %v346_v5 = vrot.slane %v318_v56, 7 }
 0x196   : > { %v333_v2 = vmul.f32 %v332_v45, %v320_v61  ;;  %v342_v3 = vmul.f32 %v340_v46, %v328_v62  ;;  %v345_v4 = vrot.slane %v320_v61, 7  ;;  %v351_v7 = vrot.slane %v325_v58, 1 }
 0x197   : > { %v336_v6 = vadd.f32 %v334_v63, %v314_v60  ;;  %v352_v8 = vrot.slane %v328_v62, 1  ;;  %v341_v11 = vmul.f32 %v340_v46, %v325_v58 }
 0x198   : > { %v335_v10 = vadd.f32 %v333_v2, %v313_v52  ;;  %v347_v12 = vsel %vm317_vm2, %v345_v4, %v346_v5  ;;  %v348_v13 = vsel %vm317_vm2, %v346_v5, %v345_v4 }
 0x199   : > { %v344_v14 = vadd.f32 %v342_v3, %v336_v6  ;;  %v349_v15 = vsel %vm305_vm1, %v348_v13, 0.0  ;;  %v353_v16 = vsel %vm324_vm3, %v351_v7, %v352_v8  ;;  %v354_v17 = vsel %vm324_vm3, %v352_v8, %v351_v7 }
 0x19a   : > { %v343_v18 = vadd.f32 %v341_v11, %v335_v10  ;;  %v356_v19 = vsel %vm308_vm4, %v354_v17, 0.0  ;;  %v361_v20 = vmul.f32 %v360_v47, %v349_v15  ;;  %v362_v21 = vmul.f32 %v360_v47, %v347_v12 }
 0x19b   : > { %v369_v22 = vmul.f32 %v368_v53, %v353_v16  ;;  %v370_v23 = vmul.f32 %v368_v53, %v356_v19  ;;  %v373_v24 = vrot.slane %v349_v15, 7  ;;  %v374_v25 = vrot.slane %v347_v12, 7 }
 0x19c   : > { %v363_v26 = vadd.f32 %v361_v20, %v343_v18  ;;  %v364_v27 = vadd.f32 %v362_v21, %v344_v14  ;;  %v379_v29 = vrot.slane %v353_v16, 1  ;;  %v380_v30 = vrot.slane %v356_v19, 1 }
 0x19d   : > { %v375_v31 = vsel %vm317_vm2, %v373_v24, %v374_v25  ;;  %v376_v32 = vsel %vm317_vm2, %v374_v25, %v373_v24 }
 0x19e   : > { %v371_v34 = vadd.f32 %v369_v22, %v363_v26  ;;  %v372_v37 = vadd.f32 %v370_v23, %v364_v27  ;;  %v377_v38 = vsel %vm305_vm1, %v376_v32, 0.0  ;;  %v381_v39 = vsel %vm324_vm3, %v379_v29, %v380_v30 }
 0x19f   : > { %v382_v40 = vsel %vm324_vm3, %v380_v30, %v379_v29  ;;  %v389_v41 = vmul.f32 %v388_v9, %v377_v38  ;;  %v390_v42 = vmul.f32 %v388_v9, %v375_v31  ;;  %v397_v45 = vmul.f32 %v396_v33, %v381_v39 }
 0x1a0   : > { %v384_v43 = vsel %vm308_vm4, %v382_v40, 0.0 }
 0x1a1   : > { %v391_v44 = vadd.f32 %v389_v41, %v371_v34  ;;  %v392_v35 = vadd.f32 %v390_v42, %v372_v37  ;;  %v398_v46 = vmul.f32 %v396_v33, %v384_v43 }
 0x1a3   : > { %v399_v47 = vadd.f32 %v397_v45, %v391_v44  ;;  %v400_v48 = vadd.f32 %v398_v46, %v392_v35 }
 0x1a5   : > { %v401_v49 = vmax.f32 %v399_v47, 0.0  ;;  %v402_v50 = vmax.f32 %v400_v48, 0.0 }
 0x1a7   : > { %v403_v51 = vpack.c.bf16 %v402_v50, %v401_v49 }
 0x1a9   : > { %666 = vmatmul.mubr.bf16.vlgmr.msra.gmra.mrb[0].mxu0 %v403_v51 }
 0x27c   : > { %v502_v28 = vpop.f32.mrb[0].mxu0 }
 0x27d   : > { %v509_v52 = vmax.f32 %v502_v28, 0.0  ;;  %v667_v36 = vpop.f32.mrb[1].mxu0 }
 0x27e   : > { %v505_v53 = vpop.f32.mrb[2].mxu0 }
 0x27f   : > { %v511_v54 = vadd.f32 %v509_v52, %v1070_v0  ;;  %v510_v55 = vmax.f32 %v505_v53, 0.0  ;;  %v668_v56 = vpop.f32.mrb[3].mxu0 }
 0x281   : > { %513 = vst [vmem:[%s257_s10] sm:$0xff] %v511_v54  ;;  %v512_v57 = vadd.f32 %v510_v55, %v1072_v1 }
 0x283   : > { %514 = vst [vmem:[%s257_s10 + $0x8] sm:$0xff] %v512_v57 }
 0x284   : > { %817 = shalt.err (!%p814_p7)
}
 0x285   : > { %s818_s26 = scalar_lea.hbm %s1157_s17, 256  ;;  %s822_s7 = scalar_lea.hbm %s1207_s5, 512 }
 0x286   : > { %p819_p9 = scmp.ne.s32.totalorder %s1157_s17, %s818_s26  ;;  %p823_p5 = scmp.lt.u32.totalorder %s1157_s17, %s1207_s5 }
 0x287   : > { %p824_p11 = scmp.lt.u32.totalorder %s822_s7, %s818_s26  ;;  %p826_p4 = scmp.lt.u32.totalorder %s818_s26, %s1157_s17 }
 0x288   : > { %p820_p2 = pnand %p819_p9, %p1008_p12 }
 0x289   : > { %p825_p1 = por %p824_p11, %p823_p5 }
 0x28a   : > { %p821_p0 = pneg %p820_p2 }
 0x28b   : > { %p827_p6 = por %p826_p4, %p825_p1 }
 0x28d   : > { %p828_p8 = pnand %p827_p6, %p821_p0 }
 0x28f   : > { %831 = shalt.err (!%p828_p8)
}
 0x290   : > { %s885_s13 = smov 128   ;;  %s886_s28 = smov 8  }
 0x291   : > { %675 = dma.vmem_to_hbm [thread:$0]  (%p1008_p12), %s1152_s29, 256, %s1157_s17, %s516_s22, %s885_s13, %s885_s13, %s886_s28  }
 0x292 PF: > { %s544_s16 = sand.u32 1, %s862_s18   ;;  %p1222_p10 = scmp.ne.s32.totalorder %s1212_s25, 0 }
 0x293   : > { %p1223_p13 = scmp.ge.s32.totalorder %s874_s21, 2  ;;  %s545_s27 = scalar_lea.sflag [#allocation4], %s544_s16 }
 0x295   : > { %p686_p3 = pnand %p1223_p13, %p1222_p10 }
 0x297   : > { %857 = dma.done.wait (!%p686_p3), %s545_s27, 256  }
 0x298   : > { %859 = vsyncadd (!%p686_p3), %s545_s27, 4294967040  ;;  %p19_p7 = scmp.ge.s32.totalorder %s973_s30, 4   ;;  %s1224_s18 = smov %s866_s19 }
 0x299   : > { %s1225_s19 = smov %s870_s20  ;;  %s1226_s20 = smov %s1004_s8 }
 0x29a   : > { %s1227_s21 = smov %s973_s30  ;;  %21 = sbr.rel (!%p19_p7) target bundleno = 6 (0x6), region = 89 }
 0x2a1   :  { %550 = vsyncpa [#allocation3], 1 }
 0x2a2   :  { %552 = vsyncpa [#allocation3 + $0x1], 1 }
 0x2a3   :  { %553 = vsyncpa [#allocation6], 1 }
 0x2a4   :  { %554 = vsyncpa [#allocation4], 1 }
 0x2a5   :  { %556 = vsyncpa [#allocation4 + $0x1], 1 }

</bundles_post_ra>
